<compile_context>
chip_gen: v7x
topology: tpu7x:2x2x1
jax: 0.10.0
libtpu: 0.0.40
codegen_flags: <defaults>
</compile_context>

<pallas_src>
import functools

import jax
import jax.numpy as jnp
from jax.experimental import pallas as pl
from jax.experimental.pallas import tpu as pltpu

_MIB = 1024 * 1024


def _sublane_multiple(dtype):
    # vreg sublane packing: f32 -> 8 rows/vreg, bf16 -> 16, int8/fp8 -> 32.
    return {4: 8, 2: 16, 1: 32}.get(jnp.dtype(dtype).itemsize, 8)


def _vmem_capacity_bytes():
    try:
        return int(pltpu.get_tpu_info().vmem_capacity_bytes)
    except Exception:
        # Conservative fallback: v7x per-TC VMEM (v5e/v6e have 128 MiB).
        return 64 * _MIB


def _ce_loss_kernel(student_ref, teacher_ref, out_ref, *,
                    temperature, batch_size, block_rows):
    inv_t = 1.0 / temperature
    s = student_ref[...].astype(jnp.float32) * inv_t
    t = teacher_ref[...].astype(jnp.float32) * inv_t

    # Student: log-softmax pieces per row (shifted logits + logsumexp).
    s_max = jnp.max(s, axis=1, keepdims=True)
    s_shift = s - s_max                                                  # (TB, C)
    s_lse = jnp.log(jnp.sum(jnp.exp(s_shift), axis=1, keepdims=True))    # (TB, 1)

    # Teacher: unnormalized softmax weights.
    t_max = jnp.max(t, axis=1, keepdims=True)
    t_w = jnp.exp(t - t_max)                                             # (TB, C)
    t_z = jnp.sum(t_w, axis=1, keepdims=True)                            # (TB, 1)

    # sum_c softmax(t) * log_softmax(s)
    #   = (sum_c t_w * s_shift) / t_z - s_lse        (since sum_c softmax(t) == 1)
    weighted = jnp.sum(t_w * s_shift, axis=1, keepdims=True)             # (TB, 1)
    # Exact divide: t_z holds only TB values per tile, so this costs nothing
    # and avoids the approx-reciprocal accuracy slack.
    contrib = weighted / t_z - s_lse                                     # (TB, 1)

    # Mask rows past the global batch (last tile may be padded).  Padded rows
    # read unspecified data (possibly inf/NaN after exp); that garbage stays
    # confined per-row and is discarded HERE, after the per-row reduction but
    # BEFORE the cross-row sum.  Do not move this mask after jnp.sum(contrib).
    row = jax.lax.broadcasted_iota(jnp.int32, contrib.shape, 0)
    global_row = pl.program_id(0) * block_rows + row
    contrib = jnp.where(global_row < batch_size, contrib, 0.0)

    scale = -(temperature * temperature) / batch_size
    partial = scale * jnp.sum(contrib)

    # Lane-dense (1, 128) partial-sum block; only lane 0 carries the value.
    lane = jax.lax.broadcasted_iota(jnp.int32, out_ref.shape, 1)
    out_ref[...] = jnp.where(lane == 0, partial, 0.0)


def ce_loss(output_batch, teacher_outputs, temperature=1.0, block_rows=None):
    """Pallas-TPU implementation of CE_Loss.forward. Inputs: (B, C) logits.

    Accepts f32 or bf16 logits; bf16 halves HBM traffic (this kernel is
    memory-bound on all TPU generations).
    """
    assert output_batch.shape == teacher_outputs.shape
    assert output_batch.ndim == 2
    B, C = output_batch.shape
    dtype = output_batch.dtype
    itemsize = jnp.dtype(dtype).itemsize
    sub = _sublane_multiple(dtype)

    vmem_cap = _vmem_capacity_bytes()
    vmem_budget = int(vmem_cap * 0.7)        # headroom for compiler scratch

    if block_rows is None:
        # Per-row VMEM footprint of one grid step:
        #   inputs : 2 arrays x 2 pipeline buffers x C x itemsize
        #   f32 temporaries (s, t/t_w, s_shift, t_w*s_shift): ~4 x C x 4 bytes
        per_row_vmem = 4 * C * itemsize + 4 * C * 4
        tb_vmem = max(sub, (vmem_budget // per_row_vmem) // sub * sub)

        # Target a few MiB of input per grid step so the ~0.35us/step overhead
        # stays hidden at HBM roofline (bigger target on v7x bandwidth).
        target_step_bytes = 12 * _MIB if vmem_cap <= 64 * _MIB else 8 * _MIB
        tb_target = max(sub, (target_step_bytes // (2 * C * itemsize)) // sub * sub)

        tb = min(tb_vmem, tb_target)
    else:
        tb = max(sub, (block_rows // sub) * sub)

    # Megacore: v7x has 2 TensorCores; a batch that would fit one tile is
    # still split into >= 2 "parallel" grid steps when B allows it.
    if B >= 2 * sub:
        tb = min(tb, pl.cdiv(pl.cdiv(B, 2), sub) * sub)
    else:
        # Tiny batch: a single whole-batch block (block dim == full dim is legal
        # even when not sublane-aligned).
        tb = min(tb, B)

    num_tiles = pl.cdiv(B, tb)

    kernel = functools.partial(
        _ce_loss_kernel,
        temperature=float(temperature),
        batch_size=B,          # global batch, NOT the block shape
        block_rows=tb,
    )

    # Always set the scoped-VMEM limit explicitly (v5e's default is 16 MiB);
    # cap it generation-aware, well inside physical VMEM (~48 MiB on v7x,
    # ~96 MiB on v5e/v6e).
    need = 2 * 2 * tb * C * itemsize + 4 * tb * C * 4 + (1 << 20)
    vmem_limit = int(min(max(need, 32 * _MIB), int(vmem_cap * 0.75)))

    cost = pl.CostEstimate(
        flops=10 * B * C,
        transcendentals=2 * B * C,
        bytes_accessed=2 * B * C * itemsize + num_tiles * 128 * 4,
    )

    partials = pl.pallas_call(
        kernel,
        out_shape=jax.ShapeDtypeStruct((1, num_tiles * 128), jnp.float32),
        grid_spec=pltpu.PrefetchScalarGridSpec(
            num_scalar_prefetch=0,
            grid=(num_tiles,),
            in_specs=[
                pl.BlockSpec((tb, C), lambda i: (i, 0)),
                pl.BlockSpec((tb, C), lambda i: (i, 0)),
            ],
            out_specs=pl.BlockSpec((1, 128), lambda i: (0, i)),
        ),
        compiler_params=pltpu.CompilerParams(
            dimension_semantics=("parallel",),
            vmem_limit_bytes=vmem_limit,
        ),
        cost_estimate=cost,
    )(output_batch, teacher_outputs)

    return jnp.sum(partials)


def _reference(output_batch, teacher_outputs, temperature=1.0):
    T = temperature
    log_p = jax.nn.log_softmax(output_batch.astype(jnp.float32) / T, axis=1)
    q = jax.nn.softmax(teacher_outputs.astype(jnp.float32) / T, axis=1)
    return -T * T * jnp.sum(log_p * q) / output_batch.shape[0]


if __name__ == "__main__":
    key = jax.random.PRNGKey(0)
    k1, k2 = jax.random.split(key)

    B, C = 8, 32          # batch=8, num_classes=32
    T = 2.0               # temperature

    student = jax.random.normal(k1, (B, C), dtype=jnp.float32)
    teacher = jax.random.normal(k2, (B, C), dtype=jnp.float32)

    loss = ce_loss(student, teacher, temperature=T)
    jax.block_until_ready(loss)

    ref = _reference(student, teacher, temperature=T)
    # Exact divide in-kernel -> tight tolerance.
    assert jnp.allclose(loss, ref, rtol=1e-5, atol=1e-5), (loss, ref)

    print("KERNEL_OK")
</pallas_src>

<mosaic_0001>
module attributes {stable_mosaic.version = 11 : i64} {
  func.func @_ce_loss_kernel(%arg0: i32, %arg1: memref<8x32xf32, #tpu.memory_space<vmem>>, %arg2: memref<8x32xf32, #tpu.memory_space<vmem>>, %arg3: memref<1x128xf32, #tpu.memory_space<vmem>>) attributes {dimension_semantics = [#tpu.dimension_semantics<parallel>], iteration_bounds = array<i64: 1>, scalar_prefetch = 0 : i64, scratch_operands = 0 : i64, tpu.core_type = #tpu.core_type<tc>, window_params = [{transform_indices = @transform_0, window_bounds = array<i64: 8, 32>}, {transform_indices = @transform_1, window_bounds = array<i64: 8, 32>}, {transform_indices = @transform_2, window_bounds = array<i64: 1, 128>}]} {
    %c0 = arith.constant 0 : index
    %c0_0 = arith.constant 0 : index
    %0 = vector.load %arg1[%c0, %c0_0] : memref<8x32xf32, #tpu.memory_space<vmem>>, vector<8x32xf32>
    %cst = arith.constant 5.000000e-01 : f32
    %1 = vector.broadcast %cst : f32 to vector<8x32xf32>
    %2 = arith.mulf %0, %1 : vector<8x32xf32>
    %c0_1 = arith.constant 0 : index
    %c0_2 = arith.constant 0 : index
    %3 = vector.load %arg2[%c0_1, %c0_2] : memref<8x32xf32, #tpu.memory_space<vmem>>, vector<8x32xf32>
    %cst_3 = arith.constant 5.000000e-01 : f32
    %4 = vector.broadcast %cst_3 : f32 to vector<8x32xf32>
    %5 = arith.mulf %3, %4 : vector<8x32xf32>
    %cst_4 = arith.constant dense<0xFF800000> : vector<8xf32>
    %6 = vector.multi_reduction <maximumf>, %2, %cst_4 [1] : vector<8x32xf32> to vector<8xf32>
    %7 = vector.shape_cast %6 : vector<8xf32> to vector<8x1xf32>
    %8 = vector.broadcast %7 : vector<8x1xf32> to vector<8x32xf32>
    %9 = arith.subf %2, %8 : vector<8x32xf32>
    %10 = math.exp %9 : vector<8x32xf32>
    %cst_5 = arith.constant dense<0.000000e+00> : vector<8xf32>
    %11 = vector.multi_reduction <add>, %10, %cst_5 [1] : vector<8x32xf32> to vector<8xf32>
    %12 = vector.shape_cast %11 : vector<8xf32> to vector<8x1xf32>
    %13 = math.log %12 : vector<8x1xf32>
    %cst_6 = arith.constant dense<0xFF800000> : vector<8xf32>
    %14 = vector.multi_reduction <maximumf>, %5, %cst_6 [1] : vector<8x32xf32> to vector<8xf32>
    %15 = vector.shape_cast %14 : vector<8xf32> to vector<8x1xf32>
    %16 = vector.broadcast %15 : vector<8x1xf32> to vector<8x32xf32>
    %17 = arith.subf %5, %16 : vector<8x32xf32>
    %18 = math.exp %17 : vector<8x32xf32>
    %cst_7 = arith.constant dense<0.000000e+00> : vector<8xf32>
    %19 = vector.multi_reduction <add>, %18, %cst_7 [1] : vector<8x32xf32> to vector<8xf32>
    %20 = vector.shape_cast %19 : vector<8xf32> to vector<8x1xf32>
    %21 = arith.mulf %18, %9 : vector<8x32xf32>
    %cst_8 = arith.constant dense<0.000000e+00> : vector<8xf32>
    %22 = vector.multi_reduction <add>, %21, %cst_8 [1] : vector<8x32xf32> to vector<8xf32>
    %23 = vector.shape_cast %22 : vector<8xf32> to vector<8x1xf32>
    %24 = arith.divf %23, %20 : vector<8x1xf32>
    %25 = arith.subf %24, %13 : vector<8x1xf32>
    %26 = tpu.iota {dimensions = array<i32: 0>} : vector<8x1xi32>
    %c8_i32 = arith.constant 8 : i32
    %27 = arith.muli %arg0, %c8_i32 : i32
    %28 = vector.broadcast %27 : i32 to vector<8x1xi32>
    %29 = arith.addi %28, %26 : vector<8x1xi32>
    %c8_i32_9 = arith.constant 8 : i32
    %30 = vector.broadcast %c8_i32_9 : i32 to vector<8x1xi32>
    %31 = arith.cmpi slt, %29, %30 : vector<8x1xi32>
    %cst_10 = arith.constant 0.000000e+00 : f32
    %32 = vector.broadcast %cst_10 : f32 to vector<8x1xf32>
    %33 = arith.select %31, %25, %32 : vector<8x1xi1>, vector<8x1xf32>
    %34 = vector.shape_cast %33 : vector<8x1xf32> to vector<1x8x1xf32>
    %cst_11 = arith.constant dense<0.000000e+00> : vector<1xf32>
    %35 = vector.multi_reduction <add>, %34, %cst_11 [1, 2] : vector<1x8x1xf32> to vector<1xf32>
    %36 = vector.shape_cast %35 : vector<1xf32> to vector<1x1x1xf32>
    %37 = vector.extract %36[0, 0, 0] : f32 from vector<1x1x1xf32>
    %cst_12 = arith.constant -5.000000e-01 : f32
    %38 = arith.mulf %cst_12, %37 : f32
    %39 = tpu.iota {dimensions = array<i32: 1>} : vector<1x128xi32>
    %c0_i32 = arith.constant 0 : i32
    %40 = vector.broadcast %c0_i32 : i32 to vector<1x128xi32>
    %41 = arith.cmpi eq, %39, %40 : vector<1x128xi32>
    %cst_13 = arith.constant 0.000000e+00 : f32
    %42 = vector.broadcast %38 : f32 to vector<1x128xf32>
    %43 = vector.broadcast %cst_13 : f32 to vector<1x128xf32>
    %44 = arith.select %41, %42, %43 : vector<1x128xi1>, vector<1x128xf32>
    %c0_14 = arith.constant 0 : index
    %c0_15 = arith.constant 0 : index
    %45 = vector.load %arg3[%c0_14, %c0_15] : memref<1x128xf32, #tpu.memory_space<vmem>>, vector<1x128xf32>
    tpu.vector_store %arg3[%c0_14, %c0_15], %44 {strides = array<i32>} : memref<1x128xf32, #tpu.memory_space<vmem>>, vector<1x128xf32>,
    return
  }
  func.func @transform_0(%arg0: i32) -> (i32, i32) {
    %c0_i32 = arith.constant 0 : i32
    %c0_i32_0 = arith.constant 0 : i32
    return %arg0, %c0_i32 : i32, i32
  }
  func.func @transform_1(%arg0: i32) -> (i32, i32) {
    %c0_i32 = arith.constant 0 : i32
    %c0_i32_0 = arith.constant 0 : i32
    return %arg0, %c0_i32 : i32, i32
  }
  func.func @transform_2(%arg0: i32) -> (i32, i32) {
    %c0_i32 = arith.constant 0 : i32
    %c0_i32_0 = arith.constant 0 : i32
    return %c0_i32, %arg0 : i32, i32
  }
}

</mosaic_0001>

<bundles_post_ra>
// kernel: tpu_custom_call.1
= control target key start
LH: loop header
LB: loop body
LE: loop exit
PB: predicated region body
PF: predicated region fallthrough
CT: control target
= control target key end

     0   :  { %7 = vsyncpa [#allocation3], 0  ;;  %s253_s0 = inlined_call_operand.hbm [shape: f32[8,32], index: 0, kind: input, shape index: {}]   ;;  %s254_s1 = inlined_call_operand.hbm [shape: f32[8,32], index: 1, kind: input, shape index: {}]   ;;  %s255_s2 = inlined_call_operand.hbm [shape: f32[1,128], index: 2, kind: output, shape index: {}]  }
   0x1   :  { %8 = vsyncpa [#allocation6], 0 }
   0x2   :  { %9 = vsyncpa [#allocation4], 0  ;;  %s194_s9 = smov [#allocation2]   ;;  %s195_s11 = smov [#allocation5]  }
   0x3   :  { %s16_s10 = sshll.u32 %s194_s9, 4  ;;  %s26_s12 = sshll.u32 %s195_s11, 4  ;;  %s17_s10 = int_to_ptr.vmem [resolvable:$true] %s16_s10  ;;  %s27_s12 = int_to_ptr.vmem [resolvable:$true] %s26_s12 }
   0x4   :  { %s122_s15 = scalar_lea.hbm %s253_s0, 128 }
   0x5   :  { %p123_p0 = scmp.ne.s32.totalorder %s253_s0, %s122_s15  ;;  %p126_p1 = scmp.lt.u32.totalorder %s122_s15, %s253_s0 }
   0x7   :  { %p128_p2 = pnand %p126_p1, %p123_p0 }
   0x9   :  { %131 = shalt.err (!%p128_p2)
}
   0xa   :  { %s132_s20 = scalar_lea.vmem %s17_s10, 128  ;;  %p137_p4 = scmp.lt.s32.totalorder %s17_s10, %s17_s10 }
   0xb   :  { %p133_p3 = scmp.ne.s32.totalorder %s17_s10, %s132_s20  ;;  %p138_p5 = scmp.lt.s32.totalorder %s132_s20, %s132_s20 }
   0xd   :  { %p139_p6 = por %p138_p5, %p137_p4 }
   0xf   :  { %p140_p7 = pnand %p139_p6, %p133_p3 }
  0x11   :  { %143 = shalt.err (!%p140_p7)
}
  0x12   :  { %19 = dma.hbm_to_vmem [thread:$0]  %s253_s0, 128, %s17_s10, [#allocation3]  }
  0x13   :  { %s144_s25 = scalar_lea.hbm %s254_s1, 128 }
  0x14   :  { %p145_p8 = scmp.ne.s32.totalorder %s254_s1, %s144_s25  ;;  %p148_p9 = scmp.lt.u32.totalorder %s144_s25, %s254_s1 }
  0x16   :  { %p150_p10 = pnand %p148_p9, %p145_p8 }
  0x18   :  { %153 = shalt.err (!%p150_p10)
}
  0x19   :  { %s154_s30 = scalar_lea.vmem %s27_s12, 128  ;;  %p159_p12 = scmp.lt.s32.totalorder %s27_s12, %s27_s12 }
  0x1a   :  { %p155_p11 = scmp.ne.s32.totalorder %s27_s12, %s154_s30  ;;  %p160_p13 = scmp.lt.s32.totalorder %s154_s30, %s154_s30 }
  0x1c   :  { %p161_p0 = por %p160_p13, %p159_p12 }
  0x1e   :  { %p162_p1 = pnand %p161_p0, %p155_p11 }
  0x20   :  { %165 = shalt.err (!%p162_p1)
}
  0x21   :  { %29 = dma.hbm_to_vmem [thread:$0]  %s254_s1, 128, %s27_s12, [#allocation6]  }
  0x22   :  { %188 = dma.done.wait [#allocation3], 128  }
  0x23   :  { %189 = vsyncadd [#allocation3], 4294967168 }
  0x24   :  { %190 = dma.done.wait [#allocation6], 128  }
  0x25   :  { %191 = vsyncadd [#allocation6], 4294967168  ;;  %v36_v0 = vld [vmem:[#allocation2] sm:$0xff]  ;;  %vm40_vm0 = vcmask 261120   ;;  %v38_v1 = vld [vmem:[#allocation5] sm:$0xff]  ;;  %vm75_vm1 = vcmask 7168   ;;  %v87_v34 = vlaneseq }
  0x26   :  { %v37_v2 = vmul.f32 0.5, %v36_v0  ;;  %v39_v3 = vmul.f32 0.5, %v38_v1  ;;  %s196_s4 = smov [#allocation7]  }
  0x27   :  { %v88_v35 = vand.u32 127, %v87_v34  ;;  %s99_s5 = sshll.u32 %s196_s4, 4  ;;  %s100_s5 = int_to_ptr.vmem [resolvable:$true] %s99_s5 }
  0x28   :  { %v41_v4 = vsel %vm40_vm0, %v37_v2, -inf  ;;  %v52_v5 = vsel %vm40_vm0, %v39_v3, -inf  ;;  %s166_s7 = scalar_lea.vmem %s100_s5, 16  ;;  %s170_s8 = scalar_lea.vmem %s100_s5, 32 }
  0x29   :  { %42 = vmax.xlane.f32.xlu0 %v41_v4  ;;  %vm89_vm2 = vcmp.eq.s32.totalorder %v88_v35, 0  ;;  %p167_p2 = scmp.ne.s32.totalorder %s100_s5, %s166_s7  ;;  %p171_p3 = scmp.lt.s32.totalorder %s100_s5, %s100_s5 }
  0x2a   :  { %p172_p4 = scmp.lt.s32.totalorder %s170_s8, %s166_s7 }
  0x2c   :  { %p173_p5 = por %p172_p4, %p171_p3 }
  0x2d   :  { %53 = vmax.xlane.f32.xlu0 %v52_v5 }
  0x2e   :  { %p174_p6 = pnand %p173_p5, %p167_p2 }
  0xb6   :  { %v43_v6 = vpop.xlane.xlu0 %42 }
  0xb7   :  { %v44_v7 = vsub.f32 %v37_v2, %v43_v6 }
  0xb9   :  { %v45_v8 = vmul.f32 1.442695, %v44_v7 }
  0xba   :  { %v54_v9 = vpop.xlane.xlu0 %53 }
  0xbb   :  { %114 = vpow2.f32 %v45_v8  ;;  %v55_v10 = vsub.f32 %v39_v3, %v54_v9 }
  0xbd   :  { %v56_v11 = vmul.f32 1.442695, %v55_v10 }
  0xbf   :  { %116 = vpow2.f32 %v56_v11 }
  0xc5   :  { %v115_v12 = vpop.eup %114 }
  0xc6   :  { %v47_v13 = vsel %vm40_vm0, %v115_v12, 0.0 }
  0xc7   :  { %48 = vadd.xlane.f32.xlu1 %v47_v13 }
  0xc9   :  { %v117_v14 = vpop.eup %116 }
  0xca   :  { %v58_v15 = vsel %vm40_vm0, %v117_v14, 0.0  ;;  %v61_v16 = vmul.f32 %v117_v14, %v44_v7 }
  0xcb   :  { %59 = vadd.xlane.f32.xlu1 %v58_v15 }
  0xcc   :  { %v62_v17 = vsel %vm40_vm0, %v61_v16, 0.0 }
  0xcd   :  { %63 = vadd.xlane.f32.xlu0 %v62_v17 }
 0x154   :  { %v49_v18 = vpop.xlane.xlu1 %48 }
 0x155   :  { %118 = vlog2.f32 %v49_v18 }
 0x158   :  { %v60_v19 = vpop.xlane.xlu1 %59 }
 0x159   :  { %120 = vrcp.f32 %v60_v19 }
 0x15a   :  { %v64_v22 = vpop.xlane.xlu0 %63 }
 0x15f   :  { %v119_v20 = vpop.eup %118 }
 0x160   :  { %v51_v23 = vmul.f32 0.6931472, %v119_v20 }
 0x163   :  { %v121_v21 = vpop.eup %120 }
 0x164   :  { %v66_v24 = vmul.f32 %v121_v21, %v64_v22 }
 0x166   :  { %v67_v25 = vsub.f32 %v66_v24, %v51_v23 }
 0x168   :  { %v76_v26 = vsel %vm75_vm1, %v67_v25, 0.0 }
 0x169   :  { %77 = vadd.xlane.f32.xlu1 %v76_v26 }
 0x1f6   :  { %v78_v27 = vpop.xlane.xlu1 %77 }
 0x1f7   :  { %v79_v28 = vrot.slane %v78_v27, 4 }
 0x1f9   :  { %v80_v29 = vadd.f32 %v79_v28, %v78_v27 }
 0x1fb   :  { %v81_v30 = vrot.slane %v80_v29, 2 }
 0x1fd   :  { %v82_v31 = vadd.f32 %v81_v30, %v80_v29 }
 0x1ff   :  { %v83_v32 = vrot.slane %v82_v31, 1 }
 0x201   :  { %v84_v33 = vadd.f32 %v83_v32, %v82_v31 }
 0x203   :  { %109 = vpush %v84_v33 }
 0x234   :  { %s110_s1 = spop %109 }
 0x235   :  { %s86_s6 = smul.f32 -0.5, %s110_s1 }
 0x237   :  { %v90_v36 = vstv %s86_s6 }
 0x238   :  { %v91_v37 = vsel %vm89_vm2, %v90_v36, 0.0 }
 0x239   :  { %92 = vst [vmem:[#allocation7] sm:$0x1] %v91_v37 }
 0x23a   :  { %177 = shalt.err (!%p174_p6)
}
 0x23b   :  { %s178_s11 = scalar_lea.hbm %s255_s2, 16 }
 0x23c   :  { %p179_p7 = scmp.ne.s32.totalorder %s255_s2, %s178_s11  ;;  %p182_p8 = scmp.lt.u32.totalorder %s178_s11, %s255_s2 }
 0x23e   :  { %p184_p9 = pnand %p182_p8, %p179_p7 }
 0x240   :  { %187 = shalt.err (!%p184_p9)
}
 0x241   :  { %102 = dma.vmem_to_hbm [thread:$0]  %s100_s5, 16, %s255_s2, [#allocation4]  }
 0x242   :  { %192 = dma.done.wait [#allocation4], 16  }
 0x243   :  { %193 = vsyncadd [#allocation4], 4294967280 }
 0x244   :  { %106 = vsyncpa [#allocation3], 1 }
 0x245   :  { %107 = vsyncpa [#allocation6], 1 }
 0x246   :  { %108 = vsyncpa [#allocation4], 1 }

</bundles_post_ra>
